<compile_context>
chip_gen: v7x
topology: tpu7x:2x2x1
jax: 0.10.0
libtpu: 0.0.40
codegen_flags: <defaults>
</compile_context>

<pallas_src>
import math

import jax
import jax.numpy as jnp
import numpy as np
from jax.experimental import pallas as pl
from jax.experimental.pallas import tpu as pltpu


# ---------------------------------------------------------------------------
# DCT filter construction (matches MultiSpectralDCTLayer.get_dct_filter)
# ---------------------------------------------------------------------------
def build_filter(pos, freq, POS):
    result = math.cos(math.pi * freq * (pos + 0.5) / POS) / math.sqrt(POS)
    if freq == 0:
        return result
    return result * math.sqrt(2)


def get_dct_filter(length, mapper_x, channel):
    """Returns the (C, L) DCT filter, same layout as the PyTorch buffer."""
    assert channel % len(mapper_x) == 0
    dct_filter = np.zeros((channel, length), dtype=np.float32)
    c_part = channel // len(mapper_x)
    for i, u_x in enumerate(mapper_x):
        for t in range(length):
            dct_filter[i * c_part:(i + 1) * c_part, t] = build_filter(t, u_x, length)
    return jnp.asarray(dct_filter)


# ---------------------------------------------------------------------------
# Kernel: x (TB, TC, L) * w (TC, L), reduce over L (the lane axis) -> (TB, TC).
# The reduce result is re-laid out on-chip to a lane-dense store; compute
# (VPU multiply + XLU reduce/relayout) has enormous slack vs. the HBM DMA.
# ---------------------------------------------------------------------------
def _dct_kernel(x_ref, w_ref, o_ref):
    prod = (x_ref[...] * w_ref[...]).astype(jnp.float32)      # (TB, TC, L) f32
    o_ref[...] = jnp.sum(prod, axis=-1).astype(o_ref.dtype)   # (TB, TC)


def _round_up(x, m):
    return ((x + m - 1) // m) * m


def _vmem_limit_bytes():
    cap = 64 * 1024 * 1024            # conservative fallback (v7x physical)
    try:
        cap = int(getattr(pltpu.get_tpu_info(), "vmem_capacity_bytes", cap))
    except Exception:
        pass
    # Leave headroom below physical capacity (compiler scratch, double-buffer
    # overshoot): ~48 MiB on v7x (64 MiB phys), ~96 MiB on v5e/v6e (128 MiB).
    return max(32 * 1024 * 1024, min(int(0.75 * cap), cap - 8 * 1024 * 1024))


def _pick_channel_tile(c):
    """Largest multiple of 128 dividing C (prefer big -> long DMA runs), else full C."""
    for cand in (512, 256, 128):
        if c >= cand and c % cand == 0:
            return cand
    return c                           # full-dim block (legal for any C)


def _pick_batch_tile(b, min_tb, padded_row_bytes, budget_bytes):
    """Largest multiple of min_tb <= B whose padded x-block fits the budget."""
    if b <= min_tb:
        return b                       # full-dim block (legal for any B)
    tb = (min(b, budget_bytes // max(padded_row_bytes, 1)) // min_tb) * min_tb
    return max(tb, min_tb)


def multi_spectral_dct_layer(x_bcl, weight_cl):
    """Matches the PyTorch module: x (B, C, L), weight (C, L) -> (B, C).

    The kernel reads x in its native (B, C, L) layout — no host/HBM transpose.
    """
    B, C, L = x_bcl.shape
    assert weight_cl.shape == (C, L)

    out_dtype = jnp.result_type(x_bcl.dtype, weight_cl.dtype)
    x_item = jnp.dtype(x_bcl.dtype).itemsize

    vmem_limit = _vmem_limit_bytes()
    x_budget = vmem_limit // 6         # ~8 MiB (v7x) / ~16 MiB (v5e/v6e) per x block

    TC = _pick_channel_tile(C)
    # Sublane packing: x block packs along TC, the output block packs along TB.
    x_pack = 8 * max(1, 4 // x_item)
    out_pack = 8 * max(1, 4 // jnp.dtype(out_dtype).itemsize)
    # Padded VMEM footprint of one batch row of the x block (L pads to 128 lanes).
    padded_row = _round_up(TC, x_pack) * _round_up(L, 128) * x_item
    TB = _pick_batch_tile(B, out_pack, padded_row, x_budget)

    # v7x megacore: prefer >= 2 parallel grid steps on small problems.
    if pl.cdiv(C, TC) * pl.cdiv(B, TB) < 2:
        if TB > out_pack:
            TB = max(out_pack, (TB // 2 // out_pack) * out_pack)
        elif TC % 256 == 0:
            TC //= 2

    # C-tiles outer / B-tiles inner: the (TC, L) weight block index is constant
    # across the inner B axis, so its DMA is skipped while B iterates.
    grid = (pl.cdiv(C, TC), pl.cdiv(B, TB))

    # TODO(synk): pipeline_mode=pl.Buffered(3) on the x spec is a possible
    # further tweak for very small blocks; left at the default depth here.
    return pl.pallas_call(
        _dct_kernel,
        out_shape=jax.ShapeDtypeStruct((B, C), out_dtype),
        grid_spec=pltpu.PrefetchScalarGridSpec(
            num_scalar_prefetch=0,
            grid=grid,
            in_specs=[
                pl.BlockSpec((TB, TC, L), lambda ci, bi: (bi, ci, 0)),
                pl.BlockSpec((TC, L), lambda ci, bi: (ci, 0)),
            ],
            out_specs=pl.BlockSpec((TB, TC), lambda ci, bi: (bi, ci)),
        ),
        compiler_params=pltpu.CompilerParams(
            dimension_semantics=("parallel", "parallel"),
            vmem_limit_bytes=vmem_limit,
        ),
    )(x_bcl, weight_cl)


# ---------------------------------------------------------------------------
# Reference (pure JAX) for sanity check
# ---------------------------------------------------------------------------
def multi_spectral_dct_layer_ref(x_bcl, weight_cl):
    return jnp.sum(x_bcl * weight_cl[None, :, :], axis=2)


if __name__ == "__main__":
    key = jax.random.PRNGKey(0)
    k1, k2 = jax.random.split(key, 2)

    # --- Test 1: small shapes (single full-array block) ----------------------
    batch, channel, length = 2, 32, 16
    mapper_x = [0, 2, 4, 6]                      # 4 freqs -> c_part = 8
    weight = get_dct_filter(length, mapper_x, channel)          # (C, L) f32
    x = jax.random.normal(k1, (batch, channel, length), dtype=jnp.float32)

    out = jax.block_until_ready(multi_spectral_dct_layer(x, weight))
    ref = multi_spectral_dct_layer_ref(x, weight)
    assert out.shape == (batch, channel)
    np.testing.assert_allclose(np.asarray(out), np.asarray(ref), rtol=1e-5, atol=1e-5)

    # --- Test 2: tiled grid (3 C-tiles), bf16 x with f32 weight -> f32 out ---
    batch2, channel2, length2 = 16, 384, 16      # TC=128, TB=16 -> grid (3, 1)
    mapper_x2 = [0, 1, 2, 3, 5, 7]               # 6 freqs -> c_part = 64
    weight2 = get_dct_filter(length2, mapper_x2, channel2)
    x2 = jax.random.normal(k2, (batch2, channel2, length2),
                           dtype=jnp.float32).astype(jnp.bfloat16)

    out2 = jax.block_until_ready(multi_spectral_dct_layer(x2, weight2))
    ref2 = multi_spectral_dct_layer_ref(x2.astype(jnp.float32), weight2)
    assert out2.dtype == jnp.float32
    np.testing.assert_allclose(np.asarray(out2, dtype=np.float32),
                               np.asarray(ref2), rtol=2e-2, atol=2e-2)

    print("KERNEL_OK")
</pallas_src>

<mosaic_0001>
module attributes {stable_mosaic.version = 11 : i64} {
  func.func @_dct_kernel(%arg0: i32, %arg1: i32, %arg2: memref<2x32x16xf32, #tpu.memory_space<vmem>>, %arg3: memref<32x16xf32, #tpu.memory_space<vmem>>, %arg4: memref<2x32xf32, #tpu.memory_space<vmem>>) attributes {dimension_semantics = [#tpu.dimension_semantics<parallel>, #tpu.dimension_semantics<parallel>], iteration_bounds = array<i64: 1, 1>, scalar_prefetch = 0 : i64, scratch_operands = 0 : i64, tpu.core_type = #tpu.core_type<tc>, window_params = [{transform_indices = @transform_0, window_bounds = array<i64: 2, 32, 16>}, {transform_indices = @transform_1, window_bounds = array<i64: 32, 16>}, {transform_indices = @transform_2, window_bounds = array<i64: 2, 32>}]} {
    %c0 = arith.constant 0 : index
    %c0_0 = arith.constant 0 : index
    %c0_1 = arith.constant 0 : index
    %0 = vector.load %arg2[%c0, %c0_0, %c0_1] : memref<2x32x16xf32, #tpu.memory_space<vmem>>, vector<2x32x16xf32>
    %c0_2 = arith.constant 0 : index
    %c0_3 = arith.constant 0 : index
    %1 = vector.load %arg3[%c0_2, %c0_3] : memref<32x16xf32, #tpu.memory_space<vmem>>, vector<32x16xf32>
    %2 = vector.shape_cast %1 : vector<32x16xf32> to vector<1x32x16xf32>
    %3 = vector.broadcast %2 : vector<1x32x16xf32> to vector<2x32x16xf32>
    %4 = arith.mulf %0, %3 : vector<2x32x16xf32>
    %cst = arith.constant dense<0.000000e+00> : vector<2x32xf32>
    %5 = vector.multi_reduction <add>, %4, %cst [2] : vector<2x32x16xf32> to vector<2x32xf32>
    %c0_4 = arith.constant 0 : index
    %c0_5 = arith.constant 0 : index
    %6 = vector.load %arg4[%c0_4, %c0_5] : memref<2x32xf32, #tpu.memory_space<vmem>>, vector<2x32xf32>
    tpu.vector_store %arg4[%c0_4, %c0_5], %5 {strides = array<i32>} : memref<2x32xf32, #tpu.memory_space<vmem>>, vector<2x32xf32>,
    return
  }
  func.func @transform_0(%arg0: i32, %arg1: i32) -> (i32, i32, i32) {
    %c0_i32 = arith.constant 0 : i32
    %c0_i32_0 = arith.constant 0 : i32
    return %arg1, %arg0, %c0_i32 : i32, i32, i32
  }
  func.func @transform_1(%arg0: i32, %arg1: i32) -> (i32, i32) {
    %c0_i32 = arith.constant 0 : i32
    %c0_i32_0 = arith.constant 0 : i32
    return %arg0, %c0_i32 : i32, i32
  }
  func.func @transform_2(%arg0: i32, %arg1: i32) -> (i32, i32) {
    %c0_i32 = arith.constant 0 : i32
    return %arg1, %arg0 : i32, i32
  }
}

</mosaic_0001>

<bundles_post_ra>
// kernel: tpu_custom_call.1
= control target key start
LH: loop header
LB: loop body
LE: loop exit
PB: predicated region body
PF: predicated region fallthrough
CT: control target
= control target key end

     0   :  { %vm32_vm0 = vcmask 130048   ;;  %s227_s0 = inlined_call_operand.vmem [shape: f32[2,32,16], index: 0, kind: input, shape index: {}]   ;;  %s228_s1 = inlined_call_operand.vmem [shape: f32[32,16], index: 1, kind: input, shape index: {}]   ;;  %s229_s2 = inlined_call_operand.hbm [shape: f32[2,32], index: 2, kind: output, shape index: {}]  }
   0x1   :  { %v16_v0 = vld [vmem:[%s227_s0 + $0x20] sm:$0xff]  ;;  %v17_v5 = vld [vmem:[%s227_s0 + $0x28] sm:$0xff]  ;;  %v18_v10 = vld [vmem:[%s227_s0 + $0x30] sm:$0xff] }
   0x2   :  { %v20_v1 = vld [vmem:[%s228_s1] sm:$0xff]  ;;  %v21_v6 = vld [vmem:[%s228_s1 + $0x8] sm:$0xff]  ;;  %v22_v11 = vld [vmem:[%s228_s1 + $0x10] sm:$0xff] }
   0x3   :  { %v12_v2 = vld [vmem:[%s227_s0] sm:$0xff]  ;;  %v28_v3 = vmul.f32 %v20_v1, %v16_v0  ;;  %v13_v7 = vld [vmem:[%s227_s0 + $0x8] sm:$0xff]  ;;  %v29_v8 = vmul.f32 %v21_v6, %v17_v5  ;;  %v14_v12 = vld [vmem:[%s227_s0 + $0x10] sm:$0xff] }
   0x4   :  { %v24_v4 = vmul.f32 %v20_v1, %v12_v2  ;;  %v25_v9 = vmul.f32 %v21_v6, %v13_v7 }
   0x5   :  { %v45_v13 = vsel %vm32_vm0, %v28_v3, 0.0 }
   0x6   :  { %v33_v14 = vsel %vm32_vm0, %v24_v4, 0.0  ;;  %46 = vadd.xlane.f32.xlu1 %v45_v13 }
   0x7   :  { %34 = vadd.xlane.f32.xlu0 %v33_v14 }
   0x8   :  { %7 = vsyncpa [#allocation3], 0  ;;  %v48_v15 = vsel %vm32_vm0, %v29_v8, 0.0  ;;  %v36_v16 = vsel %vm32_vm0, %v25_v9, 0.0  ;;  %v30_v17 = vmul.f32 %v22_v11, %v18_v10  ;;  %v26_v18 = vmul.f32 %v22_v11, %v14_v12  ;;  %v19_v19 = vld [vmem:[%s227_s0 + $0x38] sm:$0xff] }
   0x9   :  { %v23_v20 = vld [vmem:[%s228_s1 + $0x18] sm:$0xff]  ;;  %v65_v28 = vlaneseq  ;;  %vm76_vm1 = vcmask 130112   ;;  %vm83_vm2 = vcmask 195712   ;;  %vm90_vm3 = vcmask 261312  }
   0xa   :  { %v15_v21 = vld [vmem:[%s227_s0 + $0x18] sm:$0xff]  ;;  %49 = vadd.xlane.f32.xlu1 %v48_v15  ;;  %v51_v22 = vsel %vm32_vm0, %v30_v17, 0.0  ;;  %v39_v23 = vsel %vm32_vm0, %v26_v18, 0.0  ;;  %v31_v24 = vmul.f32 %v23_v20, %v19_v19  ;;  %vm111_vm4 = vcmask 1041409   ;;  %s155_s0 = smov [#allocation2]  }
   0xb   :  { %37 = vadd.xlane.f32.xlu0 %v36_v16  ;;  %v27_v25 = vmul.f32 %v23_v20, %v15_v21  ;;  %v66_v29 = vand.u32 127, %v65_v28  ;;  %v68_v34 = vshrl.u32 %v65_v28, 7  ;;  %s122_s1 = sshll.u32 %s155_s0, 4  ;;  %vm114_vm5 = vcmask 254976   ;;  %s123_s1 = int_to_ptr.vmem [resolvable:$true] %s122_s1 }
   0xc   :  { %v54_v26 = vsel %vm32_vm0, %v31_v24, 0.0  ;;  %s131_s5 = scalar_lea.vmem %s123_s1, 32  ;;  %p136_p1 = scmp.lt.s32.totalorder %s123_s1, %s123_s1 }
   0xd   :  { %v42_v27 = vsel %vm32_vm0, %v27_v25, 0.0  ;;  %v71_v32 = vadd.s32 4294967288, %v66_v29  ;;  %v78_v33 = vadd.s32 4294967280, %v66_v29  ;;  %v85_v38 = vadd.s32 4294967272, %v66_v29  ;;  %p132_p0 = scmp.ne.s32.totalorder %s123_s1, %s131_s5  ;;  %p137_p2 = scmp.lt.s32.totalorder %s131_s5, %s131_s5 }
   0xe   :  { %52 = vadd.xlane.f32.xlu1 %v51_v22  ;;  %v69_v40 = vsub.s32 %v66_v29, %v68_v34 }
   0xf   :  { %40 = vadd.xlane.f32.xlu0 %v39_v23  ;;  %v74_v37 = vsub.s32 %v71_v32, %v68_v34  ;;  %v81_v39 = vsub.s32 %v78_v33, %v68_v34  ;;  %v88_v45 = vsub.s32 %v85_v38, %v68_v34  ;;  %p138_p3 = por %p137_p2, %p136_p1 }
  0x11   :  { %p139_p4 = pnand %p138_p3, %p132_p0 }
  0x12   :  { %55 = vadd.xlane.f32.xlu1 %v54_v26 }
  0x13   :  { %43 = vadd.xlane.f32.xlu0 %v42_v27 }
  0x93   :  { %v47_v30 = vpop.xlane.xlu1 %46 }
  0x94   :  { %v35_v31 = vpop.xlane.xlu0 %34  ;;  %v95_v48 = vrot.slane %v47_v30, %v69_v40 }
  0x95   :  { %v70_v49 = vrot.slane %v35_v31, %v69_v40 }
  0x97   :  { %v50_v35 = vpop.xlane.xlu1 %49 }
  0x98   :  { %v38_v36 = vpop.xlane.xlu0 %37  ;;  %v99_v43 = vrot.slane %v50_v35, %v74_v37 }
  0x99   :  { %v75_v44 = vrot.slane %v38_v36, %v74_v37 }
  0x9a   :  { %v100_v52 = vsel %vm76_vm1, %v99_v43, %v95_v48 }
  0x9b   :  { %v53_v41 = vpop.xlane.xlu1 %52  ;;  %v77_v53 = vsel %vm76_vm1, %v75_v44, %v70_v49 }
  0x9c   :  { %v41_v42 = vpop.xlane.xlu0 %40  ;;  %v104_v46 = vrot.slane %v53_v41, %v81_v39 }
  0x9d   :  { %v82_v47 = vrot.slane %v41_v42, %v81_v39 }
  0x9e   :  { %v105_v56 = vsel %vm83_vm2, %v104_v46, %v100_v52 }
  0x9f   :  { %v56_v50 = vpop.xlane.xlu1 %55  ;;  %v84_v57 = vsel %vm83_vm2, %v82_v47, %v77_v53 }
  0xa0   :  { %v44_v51 = vpop.xlane.xlu0 %43  ;;  %v109_v54 = vrot.slane %v56_v50, %v88_v45 }
  0xa1   :  { %v89_v55 = vrot.slane %v44_v51, %v88_v45 }
  0xa2   :  { %v110_v59 = vsel %vm90_vm3, %v109_v54, %v105_v56 }
  0xa3   :  { %v91_v58 = vsel %vm90_vm3, %v89_v55, %v84_v57 }
  0xa4   :  { %v112_v60 = vsel %vm111_vm4, %v110_v59, %v91_v58 }
  0xa5   :  { %115 = vst.msk [vmem:[#allocation2] sm:$0x3] %vm114_vm5, %v112_v60 }
  0xa6   :  { %142 = shalt.err (!%p139_p4)
}
  0xa7   :  { %s143_s8 = scalar_lea.hbm %s229_s2, 32 }
  0xa8   :  { %p144_p5 = scmp.ne.s32.totalorder %s229_s2, %s143_s8  ;;  %p147_p6 = scmp.lt.u32.totalorder %s143_s8, %s229_s2 }
  0xaa   :  { %p149_p7 = pnand %p147_p6, %p144_p5 }
  0xac   :  { %152 = shalt.err (!%p149_p7)
}
  0xad   :  { %125 = dma.vmem_to_hbm [thread:$0]  %s123_s1, 32, %s229_s2, [#allocation3]  }
  0xae   :  { %153 = dma.done.wait [#allocation3], 32  }
  0xaf   :  { %154 = vsyncadd [#allocation3], 4294967264 }
  0xb0   :  { %129 = vsyncpa [#allocation3], 1 }

</bundles_post_ra>
